<compile_context>
chip_gen: v7x
topology: tpu7x:2x2x1
jax: 0.10.0
libtpu: 0.0.40
codegen_flags: <defaults>
</compile_context>

<pallas_src>
import jax
import jax.numpy as jnp
from jax.experimental import pallas as pl
from jax.experimental.pallas import tpu as pltpu


_MIN_TM = 16  # bf16 packs 2 rows/sublane; keep row tiles at multiples of 16.


def _round_up(x, m):
    return ((x + m - 1) // m) * m


def _make_fused_kernel(n_layers):
    """h -> (h @ W'_l + b'_l), ReLU between layers, last layer left pre-ReLU."""

    def kernel(*refs):
        x_ref = refs[0]
        o_ref = refs[-1]
        h = x_ref[...]                                          # bf16 [tm, n0]
        y = None
        for li in range(n_layers):
            w_ref = refs[1 + 2 * li]                            # bf16 [ni, nf] (BN folded)
            b_ref = refs[2 + 2 * li]                            # f32  [1, nf]  (BN folded)
            y = jnp.dot(h, w_ref[...],
                        preferred_element_type=jnp.float32)     # MXU, f32 accumulate
            y = y + b_ref[...]                                  # bias broadcast
            if li < n_layers - 1:
                # ReLU in f32 (no bf16 VALU on v5e), then cast for the next MXU op.
                h = jnp.maximum(y, 0.0).astype(jnp.bfloat16)
        o_ref[...] = y.astype(o_ref.dtype)                      # final block: pre-ReLU

    return kernel


def fold_bn_into_linear(params, eps=1e-5):
    """Fold eval-mode BatchNorm1d into each Linear (f32), then cast W to bf16."""
    folded = []
    for p in params:
        scale = p["gamma"] * jax.lax.rsqrt(p["run_var"] + eps)            # [ni]
        w_t = p["w_t"] * scale[:, None]                                   # [ni, nf]
        b = p["b"] + (p["beta"] - p["run_mean"] * scale) @ p["w_t"]       # [nf]
        folded.append((w_t.astype(jnp.bfloat16),
                       b.reshape(1, -1).astype(jnp.float32)))
    return folded


def _estimate_vmem_bytes(tm, feat, folded_params, ntags, out_itemsize):
    """Re-derived VMEM budget for the chosen tile (used to size vmem_limit_bytes)."""
    widths = [int(w.shape[1]) for w, _ in folded_params]
    x_tile = 2 * tm * feat * 2                                       # bf16 x, double-buffered
    weights = sum(int(w.size) * 2 + int(b.size) * 4                  # resident, single copy
                  for w, b in folded_params)
    o_tile = 2 * tm * ntags * out_itemsize                           # out, double-buffered
    inter = 2 * tm * max(widths) * 4                                 # f32 acc/intermediates
    return x_tile + weights + o_tile + inter


def linear_classifier_forward(inp, folded_params, ntags, *, tm=1024,
                              out_dtype=jnp.float32, vmem_limit_bytes=None):
    """inp: [sl, bs, 2*hidden_lstm] -> [sl, bs, ntags] (single fused pallas_call)."""
    sl, bs, feat = inp.shape
    N = sl * bs
    # Under jit this cast fuses into the producer; no extra materialized HBM pass.
    x = inp.reshape(N, feat).astype(jnp.bfloat16)

    # Tile: big enough to amortize per-grid-step overhead, clamped so that
    # cdiv(N, tm) >= 2 whenever N allows (both TCs on v7x get work; no-op v5e/v6e).
    tm_eff = max(_MIN_TM, min(tm, _round_up(pl.cdiv(N, 2), _MIN_TM)))
    grid = (pl.cdiv(N, tm_eff),)   # last block may be partial; OOB rows are row-local
                                   # garbage and their output rows are never written.

    n_layers = len(folded_params)
    in_specs = [pl.BlockSpec((tm_eff, feat), lambda i: (i, 0))]       # x row tile
    flat_args = [x]
    # Grid-invariant weights/bias: whole-array VMEM residents (outside the pipeline
    # => single-buffered, never re-DMAed per grid step).
    resident = pl.BlockSpec(memory_space=pltpu.MemorySpace.VMEM)
    for (w_t, b) in folded_params:
        in_specs += [resident, resident]
        flat_args += [w_t, b]

    out_itemsize = jnp.dtype(out_dtype).itemsize
    flops = 2 * N * sum(int(w.shape[0]) * int(w.shape[1]) for w, _ in folded_params)
    bytes_accessed = (N * feat * 2
                      + sum(int(w.size) * 2 + int(b.size) * 4 for w, b in folded_params)
                      + N * ntags * out_itemsize)
    cost = pl.CostEstimate(flops=int(flops), transcendentals=0,
                           bytes_accessed=int(bytes_accessed))

    if vmem_limit_bytes is None:
        est = _estimate_vmem_bytes(tm_eff, feat, folded_params, ntags, out_itemsize)
        if est > (30 << 20):                        # only raise above the 32 MiB default
            vmem_limit_bytes = min(int(est * 1.25) + (4 << 20), 48 << 20)  # v7x-safe

    compiler_kwargs = dict(dimension_semantics=("parallel",))   # shards rows on v7x 2 TCs
    if vmem_limit_bytes is not None:
        compiler_kwargs["vmem_limit_bytes"] = int(vmem_limit_bytes)

    out = pl.pallas_call(
        _make_fused_kernel(n_layers),
        out_shape=jax.ShapeDtypeStruct((N, ntags), out_dtype),
        grid_spec=pltpu.PrefetchScalarGridSpec(
            num_scalar_prefetch=0,
            grid=grid,
            in_specs=in_specs,
            out_specs=pl.BlockSpec((tm_eff, ntags), lambda i: (i, 0)),
        ),
        compiler_params=pltpu.CompilerParams(**compiler_kwargs),
        cost_estimate=cost,
    )(*flat_args)

    return out.reshape(sl, bs, ntags)


def init_params(key, layer_sizes):
    """Deterministic init for each LinearBlock(ni=layer_sizes[i], nf=layer_sizes[i+1])."""
    params = []
    for i in range(len(layer_sizes) - 1):
        ni, nf = layer_sizes[i], layer_sizes[i + 1]
        key, kw, kb, kg, kbt, km, kv = jax.random.split(key, 7)
        w = jax.random.normal(kw, (nf, ni), jnp.float32) * (1.0 / jnp.sqrt(ni))
        b = jax.random.normal(kb, (nf,), jnp.float32) * 0.01
        gamma = 1.0 + 0.1 * jax.random.normal(kg, (ni,), jnp.float32)
        beta = 0.1 * jax.random.normal(kbt, (ni,), jnp.float32)
        run_mean = 0.1 * jax.random.normal(km, (ni,), jnp.float32)
        run_var = 1.0 + 0.1 * jax.random.uniform(kv, (ni,), jnp.float32)
        params.append(dict(w_t=w.T, b=b, gamma=gamma, beta=beta,
                           run_mean=run_mean, run_var=run_var))
    return params


def _reference_module_f32(inp, params, ntags, eps=1e-5):
    """Pure-JAX f32 mirror of the PyTorch forward (eval mode, pre-ReLU last output)."""
    sl, bs, feat = inp.shape
    x = inp.reshape(sl * bs, feat)
    l_x = x
    for p in params:
        xn = (x - p["run_mean"]) * jax.lax.rsqrt(p["run_var"] + eps) * p["gamma"] + p["beta"]
        l_x = xn @ p["w_t"] + p["b"]
        x = jnp.maximum(l_x, 0.0)
    return l_x.reshape(sl, bs, ntags)


def _reference_kernel_numerics(inp, folded_params, ntags):
    """Pure-JAX path with the kernel's exact numerics (BN folded, bf16 operands, f32 acc)."""
    sl, bs, feat = inp.shape
    h = inp.reshape(sl * bs, feat).astype(jnp.bfloat16)
    y = None
    for li, (w_t, b) in enumerate(folded_params):
        y = jnp.dot(h, w_t, preferred_element_type=jnp.float32) + b
        if li < len(folded_params) - 1:
            h = jnp.maximum(y, 0.0).astype(jnp.bfloat16)
    return y.reshape(sl, bs, ntags)


def _run_and_check(inp, params, ntags):
    folded = fold_bn_into_linear(params)
    out = linear_classifier_forward(inp, folded, ntags)
    out = jax.block_until_ready(out)
    assert out.shape == (inp.shape[0], inp.shape[1], ntags)

    # 1) Kernel mechanics: tight check vs a pure-JAX path with identical numerics.
    ref_k = _reference_kernel_numerics(inp, folded, ntags)
    assert jnp.allclose(out, ref_k, atol=1e-4, rtol=1e-4), \
        "mismatch vs bf16-operand reference"

    # 2) Module semantics: full f32 BN(eval) -> Linear, pre-ReLU last output.
    #    Only difference is bf16 MXU operands, so allow that precision slack.
    ref_m = _reference_module_f32(inp, params, ntags)
    assert jnp.allclose(out, ref_m, atol=3e-2, rtol=3e-2), \
        "mismatch vs f32 module reference"
    return out


if __name__ == "__main__":
    # NERModel config: hidden_size_lstm=16 -> head input feature = 2*16 = 32, ntags=8.
    hidden_size_lstm = 16
    ntags = 8
    sl, bs = 7, 3          # N = 21 tokens: exercises the partial (un-padded) last block

    key = jax.random.PRNGKey(0)
    key, kx = jax.random.split(key)
    inp = jax.random.normal(kx, (sl, bs, 2 * hidden_size_lstm), jnp.float32)

    # (a) NERModel's actual head: LinearClassifier(layers=[2*hidden_lstm, ntags]).
    key, k1 = jax.random.split(key)
    params_single = init_params(k1, [2 * hidden_size_lstm, ntags])
    _run_and_check(inp, params_single, ntags)

    # (b) Deeper LinearClassifier stack (exercises the fused inter-block ReLU path).
    key, k2 = jax.random.split(key)
    params_deep = init_params(k2, [2 * hidden_size_lstm, 64, ntags])
    _run_and_check(inp, params_deep, ntags)

    print("KERNEL_OK")
</pallas_src>

<mosaic_0001>
module attributes {stable_mosaic.version = 11 : i64} {
  func.func @kernel(%arg0: i32, %arg1: memref<16x32xbf16, #tpu.memory_space<vmem>>, %arg2: memref<32x8xbf16, #tpu.memory_space<vmem>>, %arg3: memref<1x8xf32, #tpu.memory_space<vmem>>, %arg4: memref<16x8xf32, #tpu.memory_space<vmem>>) attributes {dimension_semantics = [#tpu.dimension_semantics<parallel>], iteration_bounds = array<i64: 2>, scalar_prefetch = 0 : i64, scratch_operands = 0 : i64, tpu.core_type = #tpu.core_type<tc>, window_params = [{transform_indices = @transform_0, window_bounds = array<i64: 16, 32>}, {pipeline_mode = #tpu.pipeline_mode<synchronous>, transform_indices = @transform_1, window_bounds = array<i64: 32, 8>}, {pipeline_mode = #tpu.pipeline_mode<synchronous>, transform_indices = @transform_2, window_bounds = array<i64: 1, 8>}, {transform_indices = @transform_3, window_bounds = array<i64: 16, 8>}]} {
    %c0 = arith.constant 0 : index
    %c0_0 = arith.constant 0 : index
    %0 = vector.load %arg1[%c0, %c0_0] : memref<16x32xbf16, #tpu.memory_space<vmem>>, vector<16x32xbf16>
    %c0_1 = arith.constant 0 : index
    %c0_2 = arith.constant 0 : index
    %1 = vector.load %arg2[%c0_1, %c0_2] : memref<32x8xbf16, #tpu.memory_space<vmem>>, vector<32x8xbf16>
    %cst = arith.constant dense<0.000000e+00> : vector<16x8xf32>
    %2 = tpu.matmul %0, %1, %cst {dimension_numbers = #tpu.dot_dimension_numbers<[1], [0], [0], [1], [0, 0, 1, 1], [], []>} : vector<16x32xbf16>, vector<32x8xbf16>, vector<16x8xf32> -> vector<16x8xf32>
    %c0_3 = arith.constant 0 : index
    %c0_4 = arith.constant 0 : index
    %3 = vector.load %arg3[%c0_3, %c0_4] : memref<1x8xf32, #tpu.memory_space<vmem>>, vector<1x8xf32>
    %4 = vector.broadcast %3 : vector<1x8xf32> to vector<16x8xf32>
    %5 = arith.addf %2, %4 : vector<16x8xf32>
    %c0_5 = arith.constant 0 : index
    %c0_6 = arith.constant 0 : index
    %6 = vector.load %arg4[%c0_5, %c0_6] : memref<16x8xf32, #tpu.memory_space<vmem>>, vector<16x8xf32>
    tpu.vector_store %arg4[%c0_5, %c0_6], %5 {strides = array<i32>} : memref<16x8xf32, #tpu.memory_space<vmem>>, vector<16x8xf32>,
    return
  }
  func.func @transform_0(%arg0: i32) -> (i32, i32) {
    %c0_i32 = arith.constant 0 : i32
    %c0_i32_0 = arith.constant 0 : i32
    return %arg0, %c0_i32 : i32, i32
  }
  func.func @transform_1(%arg0: i32) -> (i32, i32) {
    %c0_i32 = arith.constant 0 : i32
    %c0_i32_0 = arith.constant 0 : i32
    %c0_i32_1 = arith.constant 0 : i32
    return %c0_i32, %c0_i32_0 : i32, i32
  }
  func.func @transform_2(%arg0: i32) -> (i32, i32) {
    %c0_i32 = arith.constant 0 : i32
    %c0_i32_0 = arith.constant 0 : i32
    %c0_i32_1 = arith.constant 0 : i32
    return %c0_i32, %c0_i32_0 : i32, i32
  }
  func.func @transform_3(%arg0: i32) -> (i32, i32) {
    %c0_i32 = arith.constant 0 : i32
    %c0_i32_0 = arith.constant 0 : i32
    return %arg0, %c0_i32 : i32, i32
  }
}

</mosaic_0001>

<bundles_post_ra>
// kernel: tpu_custom_call.1
= control target key start
LH: loop header
LB: loop body
LE: loop exit
PB: predicated region body
PF: predicated region fallthrough
CT: control target
= control target key end

     0   :  { %s736_s12 = smov 0   ;;  %s738_s13 = smov 0   ;;  %s823_s0 = inlined_call_operand.vmem [shape: bf16[21,32], index: 0, kind: input, shape index: {}]   ;;  %s824_s1 = inlined_call_operand.vmem [shape: bf16[32,8], index: 1, kind: input, shape index: {}]   ;;  %s825_s2 = inlined_call_operand.vmem [shape: f32[1,8], index: 2, kind: input, shape index: {}]   ;;  %s826_s3 = inlined_call_operand.vmem [shape: f32[21,8], index: 3, kind: output, shape index: {}]  }
   0x1   :  { %s740_s14 = smov 0  }
   0x2 LB: > { %s749_s15 = sadd.s32 4294967295, %s680_s14   ;;  %s751_s16 = sadd.s32 1, %s680_s14   ;;  %s680_s14 = sphi %s740_s14, %s830_s14   ;;  %s676_s13 = sphi %s738_s13, %s829_s13   ;;  %s672_s12 = sphi %s736_s12, %s828_s12  }
   0x3   : > { %s85_s17 = ssub.s32 %s680_s14, %s751_s16  ;;  %s88_s18 = sadd.s32 1, %s676_s13 }
   0x4   : > { %p86_p0 = scmp.eq.s32.totalorder %s85_s17, 0  ;;  %p98_p1 = scmp.ne.s32.totalorder %s676_s13, %s672_s12 }
   0x5   : > { %p99_p2 = scmp.eq.s32.totalorder %s749_s15, 1  ;;  %p493_p3 = scmp.ge.s32.totalorder %s680_s14, 1 }
   0x6   : > { %s759_s19 = scalar_select %p86_p0, %s676_s13, %s88_s18  }
   0x7   : > { %p761_p4 = por %p99_p2, %p98_p1  ;;  %p146_p5 = scmp.lt.s32.totalorder %s680_s14, 3 }
   0x9   : > { %p147_p6 = pnand %p493_p3, %p146_p5 }
   0xa   : > { %v623_v0 = vld [vmem:[%s824_s1] sm:$0xff] (!%p147_p6)   ;;  %v714_v1 = vmov (!%p147_p6), 0.0   ;;  %v624_v2 = vld [vmem:[%s824_s1 + $0x8] sm:$0xff] (!%p147_p6)   ;;  %vm715_vm0 = vmmov (!%p147_p6), 0   ;;  %s495_s25 = sshll.u32 (!%p147_p6), %s749_s15, 1  ;;  %vm223_vm1 = vcmask (!%p147_p6), 261120  }
   0xb   : > { %150 = sbr.rel (%p147_p6) target bundleno = 289 (0x121), region = 32  ;;  %525 = vmatprep.subr.bf16.mxu0 (!%p147_p6), %v714_v1  ;;  %529 = vmatprep.mubr.msk.bf16.mxu0 (!%p147_p6), %vm715_vm0, %v714_v1  ;;  %p178_p7 = scmp.lt.s32.totalorder (!%p147_p6), %s495_s25, 2  ;;  %v497_v4 = vld [vmem:[%s825_s2] ss:$0 sm:$0xff] (!%p147_p6)  ;;  %vm268_vm2 = vcmask (!%p147_p6), 64512  }
   0xc   : > { %526 = vmatpush3.bf16.msra.mxu0 (!%p147_p6), %v623_v0  ;;  %s170_s4 = sand.u32 (!%p147_p6), 1, %s672_s12  }
   0xd   : > { %527 = vmatprep.subr.bf16.mxu0 (!%p147_p6), %v714_v1  ;;  %s494_s5 = sshll.u32 (!%p147_p6), %s170_s4, 4 }
   0xe   : > { %s779_s8 = scalar_lea.vmem (!%p147_p6), [#allocation2], %s494_s5  }
  0x10   : > { %528 = vmatpush3.bf16.msra.mxu0 (!%p147_p6), %v624_v2 }
  0x12   : > { %s179_s26 = scalar_select %p178_p7, %s495_s25, 2 }
  0x13   : > { %s279_s9 = ssub.s32 (%p761_p4), 3, %s495_s25  ;;  %s519_s10 = sshll.u32 (%p761_p4), %s749_s15, 4 }
  0x14   : > { %s496_s27 = sshll.u32 %s179_s26, 2  ;;  %p280_p8 = scmp.lt.s32.totalorder (%p761_p4), %s279_s9, 2 }
  0x15   : > { %s181_s30 = scalar_lea.vmem %s823_s0, %s496_s27  ;;  %s789_s14 = scalar_lea.vmem (%p761_p4), %s826_s3, %s519_s10  }
  0x16   : > { %v625_v3 = vld [vmem:[%s181_s30] sm:$0xff]  }
  0x17   : > { %530 = vmatmul.mubr.msk.bf16.vlgmr.msra.gmra.mrb[0].mxu0 %vm223_vm1, %v625_v3 }
  0xe9   : > { %277 = sbr.rel (!%p761_p4) target bundleno = 289 (0x121), region = 36 }
  0xea   : > { %v261_v5 = vpop.f32.mrb[0].mxu0 }
  0xeb   : > { %v262_v6 = vadd.f32 %v497_v4, %v261_v5  ;;  %v531_v7 = vpop.f32.mrb[1].mxu0 }
  0xec   : > { %v264_v8 = vpop.f32.mrb[2].mxu0 }
  0xed   : > { %269 = vst.msk [vmem:[%s779_s8] sm:$0xff] %vm268_vm2, %v262_v6  ;;  %v265_v9 = vadd.f32 %v497_v4, %v264_v8  ;;  %v532_v10 = vpop.f32.mrb[3].mxu0 }
  0xef   : > { %270 = vst.msk [vmem:[%s779_s8 + $0x8] sm:$0xff] %vm268_vm2, %v265_v9 }
  0xf0   : > { %s832_s9 = smov (!%p280_p8, %s279_s9), 2 }
  0xf1   : > { %s504_s17 = sshll.u32 %s832_s9, 7 }
  0xf2   : > { %p507_p9 = scmp.eq.s32.totalorder %s504_s17, 0 }
  0xf3   : > { %s795_s18 = sshrl.u32 (!%p507_p9), %s832_s9, 1 }
  0xf4   : > { %288 = sbr.rel (%p507_p9) target bundleno = 289 (0x121), region = 40  ;;  %p508_p10 = scmp.le.s32.totalorder (!%p507_p9), %s795_s18, 0 }
  0xfb   : > { %446 = sbr.rel (%p508_p10) target bundleno = 268 (0x10c), region = 116  ;;  %s682_s15 = smov (!%p508_p10), %s789_s14  }
  0xfc   : > { %s686_s20 = smov (!%p508_p10), %s779_s8   ;;  %s690_s21 = smov (!%p508_p10), 0  }
  0xfd   : > { %s694_s22 = smov (!%p508_p10), 0  }
 0x102 LB: >> { %v352_v11 = vld [vmem:[%s688_s20] sm:$0xff]  ;;  %v354_v12 = vld [vmem:[%s688_s20 + $0x8] sm:$0xff]  ;;  %s356_s23 = sadd.s32 1, %s692_s21  ;;  %s346_s22 = sadd.s32 1, %s696_s22   ;;  %s696_s22 = sphi %s694_s22, %s346_s22   ;;  %s692_s21 = sphi %s690_s21, %s691_s21   ;;  %s688_s20 = sphi %s686_s20, %s361_s20   ;;  %s684_s15 = sphi %s682_s15, %s362_s15  }
 0x103   : >> { %353 = vst [vmem:[%s684_s15] sm:$0xff] %v352_v11  ;;  %355 = vst [vmem:[%s684_s15 + $0x8] sm:$0xff] %v354_v12  ;;  %p357_p11 = scmp.ge.s32.totalorder %s356_s23, %s795_s18  ;;  %p345_p12 = scmp.ge.s32.totalorder %s346_s22, %s795_s18 }
 0x105   : >> { %s834_s23 = smov (%p357_p11, %s356_s23), 0  ;;  %348 = sbr.rel (!%p345_p12) target bundleno = 258 (0x102), region = 122 }
 0x106   : >> { %s509_s24 = sshll.u32 %s834_s23, 4  ;;  %s691_s21 = smov %s834_s23  }
 0x107   : >> { %s361_s20 = scalar_lea.vmem %s779_s8, %s509_s24 [#allocation2]   ;;  %s362_s15 = scalar_lea.vmem %s789_s14, %s509_s24  }
 0x10c PF: > { %s805_s25 = sand.u32 1, %s832_s9   ;;  %s520_s26 = sshll.u32 %s795_s18, 4 }
 0x10d   : > { %s367_s27 = scalar_lea.vmem %s779_s8, %s520_s26 [#allocation2]   ;;  %s369_s28 = scalar_lea.vmem %s789_s14, %s520_s26  }
 0x10e   : > { %p514_p13 = scmp.le.s32.totalorder %s805_s25, 0 }
 0x10f   : > { %s698_s29 = smov (!%p514_p13), %s369_s28   ;;  %s702_s30 = smov (!%p514_p13), %s367_s27  }
 0x110   : > { %460 = sbr.rel (%p514_p13) target bundleno = 289 (0x121), region = 127  ;;  %s706_s4 = smov (!%p514_p13), 0  }
 0x111   : > { %s710_s5 = smov (!%p514_p13), 0  }
 0x117 LB: >> { %v379_v13 = vld [vmem:[%s704_s30] sm:$0xff]  ;;  %s381_s6 = sadd.s32 1, %s708_s4  ;;  %s373_s5 = sadd.s32 1, %s712_s5   ;;  %s712_s5 = sphi %s710_s5, %s373_s5   ;;  %s708_s4 = sphi %s706_s4, %s707_s4   ;;  %s704_s30 = sphi %s702_s30, %s386_s30   ;;  %s700_s29 = sphi %s698_s29, %s387_s29  }
 0x118   : >> { %380 = vst [vmem:[%s700_s29] sm:$0xff] %v379_v13  ;;  %p382_p0 = scmp.ge.s32.totalorder %s381_s6, %s805_s25  ;;  %p372_p1 = scmp.ge.s32.totalorder %s373_s5, %s805_s25 }
 0x11a   : >> { %s836_s6 = smov (%p382_p0, %s381_s6), 0  ;;  %375 = sbr.rel (!%p372_p1) target bundleno = 279 (0x117), region = 133 }
 0x11b   : >> { %s515_s7 = sshll.u32 %s836_s6, 3  ;;  %s707_s4 = smov %s836_s6  }
 0x11c   : >> { %s386_s30 = scalar_lea.vmem %s367_s27, %s515_s7 [#allocation2]   ;;  %s387_s29 = scalar_lea.vmem %s369_s28, %s515_s7  }
 0x121 PF: > { %p10_p2 = scmp.ge.s32.totalorder %s751_s16, 4   ;;  %s828_s12 = smov %s676_s13 }
 0x122   : > { %s829_s13 = smov %s759_s19  ;;  %s830_s14 = smov %s751_s16 }
 0x123   :  { %12 = sbr.rel (!%p10_p2) target bundleno = 2 (0x2), region = 144 }

</bundles_post_ra>
